<compile_context>
chip_gen: v6e
topology: v6e:2x2x1
jax: 0.10.0
libtpu: 0.0.40
codegen_flags: <defaults>
</compile_context>

<pallas_src>
import jax
import jax.numpy as jnp
from jax.experimental import pallas as pl
from jax.experimental.pallas import tpu as pltpu


def _gelu_exact(x):
    """Exact (erf-based) GELU matching torch.nn.GELU() default, on f32 input.

    erf uses the Abramowitz & Stegun 7.1.26 polynomial (|err| <= 1.5e-7).
    exp and the reciprocal go to the EUP slot; everything else is plain VALU
    ops guaranteed to lower on v5e / v6e / v7x.
    """
    z = x * jnp.float32(0.7071067811865476)  # x / sqrt(2)
    a = jnp.abs(z)
    t = pl.reciprocal(1.0 + jnp.float32(0.3275911) * a, approx=True)  # EUP
    poly = t * (jnp.float32(0.254829592)
                + t * (jnp.float32(-0.284496736)
                       + t * (jnp.float32(1.421413741)
                              + t * (jnp.float32(-1.453152027)
                                     + t * jnp.float32(1.061405429)))))
    erf_abs = 1.0 - poly * jnp.exp(-a * a)  # exp -> EUP
    erf = jnp.where(z >= 0, erf_abs, -erf_abs)
    return 0.5 * x * (1.0 + erf)


def _mlp_kernel(x_ref, w1_ref, b1_ref, w2_ref, b2_ref, o_ref, acc_ref):
    # Grid: (row tiles ["parallel"], H chunks ["arbitrary" reduction]).
    #   x_ref:  (tm, F)          row tile of the flattened input (compute dtype)
    #   w1_ref: (F, th)          chunk of W1^T (compute dtype)
    #   b1_ref: (1, th)          f32
    #   w2_ref: (th, F)          chunk of W2^T (compute dtype)
    #   b2_ref: (1, F)           f32
    #   acc_ref:(tm, F) f32 VMEM scratch accumulator (lives across H chunks)
    k = pl.program_id(1)

    @pl.when(k == 0)
    def _():
        acc_ref[...] = jnp.zeros_like(acc_ref)

    # First matmul accumulates in f32 on the MXU; bias + GELU stay in f32.
    h = jnp.dot(x_ref[...], w1_ref[...], preferred_element_type=jnp.float32)
    h = _gelu_exact(h + b1_ref[...])
    # Downcast GELU output only for the MXU input of the second matmul.
    acc_ref[...] += jnp.dot(h.astype(w2_ref.dtype), w2_ref[...],
                            preferred_element_type=jnp.float32)

    @pl.when(k == pl.num_programs(1) - 1)
    def _():
        o_ref[...] = (acc_ref[...] + b2_ref[...]).astype(o_ref.dtype)


def prepare_mlp_params(w1, b1, w2, b2, *, compute_dtype=jnp.bfloat16):
    """Init-time prep: transpose + cast weights ONCE (not per forward call).

    PyTorch Linear layout in: w1 (H, F), b1 (H,), w2 (F, H), b2 (F,).
    """
    H, F = w1.shape
    return {
        "w1t": jnp.asarray(w1).T.astype(compute_dtype),   # (F, H)
        "b1": jnp.asarray(b1).reshape(1, H).astype(jnp.float32),
        "w2t": jnp.asarray(w2).T.astype(compute_dtype),   # (H, F)
        "b2": jnp.asarray(b2).reshape(1, F).astype(jnp.float32),
    }


def _round_up(x, m):
    return ((x + m - 1) // m) * m


def mlp_feed_forward(x, params, *, tile_m=512, tile_h_max=512):
    """x: (..., F). params from prepare_mlp_params."""
    w1t, b1r, w2t, b2r = params["w1t"], params["b1"], params["w2t"], params["b2"]
    F, H = w1t.shape
    compute_dtype = w1t.dtype
    out_dtype = x.dtype

    orig_shape = x.shape
    x2 = x.reshape(-1, F).astype(compute_dtype)
    M = x2.shape[0]

    # --- row tiling: sublane-aligned, >=2 parallel steps when possible (v7x 2 TCs)
    m8 = _round_up(max(M, 1), 8)
    tm = min(tile_m, m8)
    if m8 >= 16 and m8 <= tm:          # would collapse to a 1-step grid -> split in two
        tm = _round_up(m8 // 2, 8)
    m_steps = pl.cdiv(m8, tm)
    m_pad = m_steps * tm
    if m_pad != M:
        x2 = jnp.pad(x2, ((0, m_pad - M), (0, 0)))

    # --- H chunking: full H if it is small, else a 128-multiple divisor <= tile_h_max
    if H <= tile_h_max:
        tile_h = H
    else:
        tile_h = H
        for cand in range(tile_h_max - (tile_h_max % 128), 127, -128):
            if H % cand == 0:
                tile_h = cand
                break
    h_steps = H // tile_h

    # --- VMEM budget from the actual tile footprint (headroom, capped < v7x 64 MiB)
    cd = jnp.dtype(compute_dtype).itemsize
    od = jnp.dtype(out_dtype).itemsize
    per_step = (
        2 * tm * F * cd                       # x tile (double-buffered)
        + 2 * tm * F * od                     # out tile (double-buffered)
        + 2 * 2 * F * tile_h * cd             # W1^T + W2^T chunks (double-buffered)
        + 2 * (tile_h + F) * 4                # biases (f32)
        + tm * F * 4                          # f32 accumulator scratch
        + tm * tile_h * 4                     # in-flight (tm, th) f32 intermediate
    )
    vmem_limit = int(min(max(per_step * 3 // 2 + (4 << 20), 16 << 20), 56 << 20))

    cost = pl.CostEstimate(
        flops=4 * M * F * H,                  # two matmuls, 2 flops/MAC each
        transcendentals=M * H,                # exp in GELU
        bytes_accessed=int(x2.size * cd + M * F * od
                           + (w1t.size + w2t.size) * cd + (b1r.size + b2r.size) * 4),
    )

    out = pl.pallas_call(
        _mlp_kernel,
        out_shape=jax.ShapeDtypeStruct((m_pad, F), out_dtype),
        grid_spec=pltpu.PrefetchScalarGridSpec(
            num_scalar_prefetch=0,
            grid=(m_steps, h_steps),
            in_specs=[
                pl.BlockSpec((tm, F), lambda i, k: (i, 0)),        # x rows
                pl.BlockSpec((F, tile_h), lambda i, k: (0, k)),    # W1^T chunk
                pl.BlockSpec((1, tile_h), lambda i, k: (0, k)),    # b1 chunk
                pl.BlockSpec((tile_h, F), lambda i, k: (k, 0)),    # W2^T chunk
                pl.BlockSpec((1, F), lambda i, k: (0, 0)),         # b2
            ],
            out_specs=pl.BlockSpec((tm, F), lambda i, k: (i, 0)),
            scratch_shapes=[pltpu.VMEM((tm, F), jnp.float32)],
        ),
        compiler_params=pltpu.CompilerParams(
            dimension_semantics=("parallel", "arbitrary"),
            vmem_limit_bytes=vmem_limit,
        ),
        cost_estimate=cost,
    )(x2, w1t, b1r, w2t, b2r)

    if m_pad != M:
        out = out[:M]
    return out.reshape(orig_shape)


def _reference_f32(x, w1, b1, w2, b2):
    """Pure-JAX f32 replica of the PyTorch forward (dropout p=0 -> identity)."""
    h = x @ w1.T + b1
    h = jax.nn.gelu(h, approximate=False)   # torch.nn.GELU() default = exact erf GELU
    return h @ w2.T + b2


if __name__ == "__main__":
    B, N = 2, 8                              # batch, sequence length
    n_in_feat, n_hidden_feat = 128, 512      # lane-aligned transformer-MLP sizes

    key = jax.random.PRNGKey(0)
    kx, k1, k2, k3, k4 = jax.random.split(key, 5)

    x = jax.random.normal(kx, (B, N, n_in_feat), dtype=jnp.float32)
    # PyTorch Linear layout: (out_features, in_features).
    w1 = jax.random.normal(k1, (n_hidden_feat, n_in_feat), dtype=jnp.float32) * 0.1
    b1 = jax.random.normal(k2, (n_hidden_feat,), dtype=jnp.float32) * 0.1
    w2 = jax.random.normal(k3, (n_in_feat, n_hidden_feat), dtype=jnp.float32) * 0.1
    b2 = jax.random.normal(k4, (n_in_feat,), dtype=jnp.float32) * 0.1

    params = prepare_mlp_params(w1, b1, w2, b2, compute_dtype=jnp.bfloat16)

    out = mlp_feed_forward(x, params)
    out = jax.block_until_ready(out)

    ref = _reference_f32(x, w1, b1, w2, b2)
    assert out.shape == x.shape
    # Tolerance accounts for bf16 matmul inputs (vs the exact f32 reference)
    # plus the polynomial-erf / approx-reciprocal GELU.
    max_err = jnp.max(jnp.abs(out - ref))
    assert jnp.allclose(out, ref, atol=1e-1, rtol=2e-2), (
        f"mismatch vs reference, max abs err {max_err}")

    print("KERNEL_OK")
</pallas_src>

<mosaic_0001>
module attributes {stable_mosaic.version = 11 : i64} {
  func.func @_mlp_kernel(%arg0: i32, %arg1: i32, %arg2: memref<8x128xbf16, #tpu.memory_space<vmem>>, %arg3: memref<128x512xbf16, #tpu.memory_space<vmem>>, %arg4: memref<1x512xf32, #tpu.memory_space<vmem>>, %arg5: memref<512x128xbf16, #tpu.memory_space<vmem>>, %arg6: memref<1x128xf32, #tpu.memory_space<vmem>>, %arg7: memref<8x128xf32, #tpu.memory_space<vmem>>, %arg8: memref<8x128xf32, #tpu.memory_space<vmem>>) attributes {dimension_semantics = [#tpu.dimension_semantics<parallel>, #tpu.dimension_semantics<arbitrary>], iteration_bounds = array<i64: 2, 1>, scalar_prefetch = 0 : i64, scratch_operands = 1 : i64, tpu.core_type = #tpu.core_type<tc>, window_params = [{transform_indices = @transform_0, window_bounds = array<i64: 8, 128>}, {transform_indices = @transform_1, window_bounds = array<i64: 128, 512>}, {transform_indices = @transform_2, window_bounds = array<i64: 1, 512>}, {transform_indices = @transform_3, window_bounds = array<i64: 512, 128>}, {pipeline_mode = #tpu.pipeline_mode<synchronous>, transform_indices = @transform_4, window_bounds = array<i64: 1, 128>}, {transform_indices = @transform_5, window_bounds = array<i64: 8, 128>}]} {
    %c0_i32 = arith.constant 0 : i32
    %0 = arith.cmpi eq, %arg1, %c0_i32 : i32
    %1 = arith.extui %0 : i1 to i32
    %c0_i32_0 = arith.constant 0 : i32
    %2 = arith.cmpi ne, %1, %c0_i32_0 : i32
    scf.if %2 {
      %cst_29 = arith.constant 0.000000e+00 : f32
      %57 = vector.broadcast %cst_29 : f32 to vector<8x128xf32>
      %c0_30 = arith.constant 0 : index
      %c0_31 = arith.constant 0 : index
      %58 = vector.load %arg8[%c0_30, %c0_31] : memref<8x128xf32, #tpu.memory_space<vmem>>, vector<8x128xf32>
      tpu.vector_store %arg8[%c0_30, %c0_31], %57 {strides = array<i32>} : memref<8x128xf32, #tpu.memory_space<vmem>>, vector<8x128xf32>,
    } else {
    }
    %c0 = arith.constant 0 : index
    %c0_1 = arith.constant 0 : index
    %3 = vector.load %arg2[%c0, %c0_1] : memref<8x128xbf16, #tpu.memory_space<vmem>>, vector<8x128xbf16>
    %c0_2 = arith.constant 0 : index
    %c0_3 = arith.constant 0 : index
    %4 = vector.load %arg3[%c0_2, %c0_3] : memref<128x512xbf16, #tpu.memory_space<vmem>>, vector<128x512xbf16>
    %cst = arith.constant dense<0.000000e+00> : vector<8x512xf32>
    %5 = tpu.matmul %3, %4, %cst {dimension_numbers = #tpu.dot_dimension_numbers<[1], [0], [0], [1], [0, 0, 1, 1], [], []>} : vector<8x128xbf16>, vector<128x512xbf16>, vector<8x512xf32> -> vector<8x512xf32>
    %c0_4 = arith.constant 0 : index
    %c0_5 = arith.constant 0 : index
    %6 = vector.load %arg4[%c0_4, %c0_5] : memref<1x512xf32, #tpu.memory_space<vmem>>, vector<1x512xf32>
    %7 = vector.broadcast %6 : vector<1x512xf32> to vector<8x512xf32>
    %8 = arith.addf %5, %7 : vector<8x512xf32>
    %cst_6 = arith.constant 0.707106769 : f32
    %9 = vector.broadcast %cst_6 : f32 to vector<8x512xf32>
    %10 = arith.mulf %8, %9 : vector<8x512xf32>
    %11 = math.absf %10 : vector<8x512xf32>
    %cst_7 = arith.constant 0.327591091 : f32
    %12 = vector.broadcast %cst_7 : f32 to vector<8x512xf32>
    %13 = arith.mulf %12, %11 : vector<8x512xf32>
    %cst_8 = arith.constant 1.000000e+00 : f32
    %14 = vector.broadcast %cst_8 : f32 to vector<8x512xf32>
    %15 = arith.addf %14, %13 : vector<8x512xf32>
    %16 = tpu.reciprocal %15 {approx = true} : vector<8x512xf32> -> vector<8x512xf32>
    %cst_9 = arith.constant 1.06140542 : f32
    %17 = vector.broadcast %cst_9 : f32 to vector<8x512xf32>
    %18 = arith.mulf %16, %17 : vector<8x512xf32>
    %cst_10 = arith.constant -1.45315206 : f32
    %19 = vector.broadcast %cst_10 : f32 to vector<8x512xf32>
    %20 = arith.addf %19, %18 : vector<8x512xf32>
    %21 = arith.mulf %16, %20 : vector<8x512xf32>
    %cst_11 = arith.constant 1.42141378 : f32
    %22 = vector.broadcast %cst_11 : f32 to vector<8x512xf32>
    %23 = arith.addf %22, %21 : vector<8x512xf32>
    %24 = arith.mulf %16, %23 : vector<8x512xf32>
    %cst_12 = arith.constant -0.284496725 : f32
    %25 = vector.broadcast %cst_12 : f32 to vector<8x512xf32>
    %26 = arith.addf %25, %24 : vector<8x512xf32>
    %27 = arith.mulf %16, %26 : vector<8x512xf32>
    %cst_13 = arith.constant 0.254829586 : f32
    %28 = vector.broadcast %cst_13 : f32 to vector<8x512xf32>
    %29 = arith.addf %28, %27 : vector<8x512xf32>
    %30 = arith.mulf %16, %29 : vector<8x512xf32>
    %cst_14 = arith.constant 0.000000e+00 : f32
    %31 = vector.broadcast %cst_14 : f32 to vector<8x512xf32>
    %32 = arith.subf %31, %11 : vector<8x512xf32>
    %33 = arith.mulf %32, %11 : vector<8x512xf32>
    %34 = math.exp %33 : vector<8x512xf32>
    %35 = arith.mulf %30, %34 : vector<8x512xf32>
    %cst_15 = arith.constant 1.000000e+00 : f32
    %36 = vector.broadcast %cst_15 : f32 to vector<8x512xf32>
    %37 = arith.subf %36, %35 : vector<8x512xf32>
    %cst_16 = arith.constant 0.000000e+00 : f32
    %38 = vector.broadcast %cst_16 : f32 to vector<8x512xf32>
    %39 = arith.cmpf oge, %10, %38 : vector<8x512xf32>
    %cst_17 = arith.constant 0.000000e+00 : f32
    %40 = vector.broadcast %cst_17 : f32 to vector<8x512xf32>
    %41 = arith.subf %40, %37 : vector<8x512xf32>
    %42 = arith.select %39, %37, %41 : vector<8x512xi1>, vector<8x512xf32>
    %cst_18 = arith.constant 5.000000e-01 : f32
    %43 = vector.broadcast %cst_18 : f32 to vector<8x512xf32>
    %44 = arith.mulf %43, %8 : vector<8x512xf32>
    %cst_19 = arith.constant 1.000000e+00 : f32
    %45 = vector.broadcast %cst_19 : f32 to vector<8x512xf32>
    %46 = arith.addf %45, %42 : vector<8x512xf32>
    %47 = arith.mulf %44, %46 : vector<8x512xf32>
    %c0_20 = arith.constant 0 : index
    %c0_21 = arith.constant 0 : index
    %48 = vector.load %arg8[%c0_20, %c0_21] : memref<8x128xf32, #tpu.memory_space<vmem>>, vector<8x128xf32>
    %49 = arith.truncf %47 : vector<8x512xf32> to vector<8x512xbf16>
    %c0_22 = arith.constant 0 : index
    %c0_23 = arith.constant 0 : index
    %50 = vector.load %arg5[%c0_22, %c0_23] : memref<512x128xbf16, #tpu.memory_space<vmem>>, vector<512x128xbf16>
    %cst_24 = arith.constant dense<0.000000e+00> : vector<8x128xf32>
    %51 = tpu.matmul %49, %50, %cst_24 {dimension_numbers = #tpu.dot_dimension_numbers<[1], [0], [0], [1], [0, 0, 1, 1], [], []>} : vector<8x512xbf16>, vector<512x128xbf16>, vector<8x128xf32> -> vector<8x128xf32>
    %52 = arith.addf %48, %51 : vector<8x128xf32>
    %c0_25 = arith.constant 0 : index
    %c0_26 = arith.constant 0 : index
    %53 = vector.load %arg8[%c0_25, %c0_26] : memref<8x128xf32, #tpu.memory_space<vmem>>, vector<8x128xf32>
    tpu.vector_store %arg8[%c0_25, %c0_26], %52 {strides = array<i32>} : memref<8x128xf32, #tpu.memory_space<vmem>>, vector<8x128xf32>,
    %c0_i32_27 = arith.constant 0 : i32
    %54 = arith.cmpi eq, %arg1, %c0_i32_27 : i32
    %55 = arith.extui %54 : i1 to i32
    %c0_i32_28 = arith.constant 0 : i32
    %56 = arith.cmpi ne, %55, %c0_i32_28 : i32
    scf.if %56 {
      %c0_29 = arith.constant 0 : index
      %c0_30 = arith.constant 0 : index
      %57 = vector.load %arg8[%c0_29, %c0_30] : memref<8x128xf32, #tpu.memory_space<vmem>>, vector<8x128xf32>
      %c0_31 = arith.constant 0 : index
      %c0_32 = arith.constant 0 : index
      %58 = vector.load %arg6[%c0_31, %c0_32] : memref<1x128xf32, #tpu.memory_space<vmem>>, vector<1x128xf32>
      %59 = vector.broadcast %58 : vector<1x128xf32> to vector<8x128xf32>
      %60 = arith.addf %57, %59 : vector<8x128xf32>
      %c0_33 = arith.constant 0 : index
      %c0_34 = arith.constant 0 : index
      %61 = vector.load %arg7[%c0_33, %c0_34] : memref<8x128xf32, #tpu.memory_space<vmem>>, vector<8x128xf32>
      tpu.vector_store %arg7[%c0_33, %c0_34], %60 {strides = array<i32>} : memref<8x128xf32, #tpu.memory_space<vmem>>, vector<8x128xf32>,
    } else {
    }
    return
  }
  func.func @transform_0(%arg0: i32, %arg1: i32) -> (i32, i32) {
    %c0_i32 = arith.constant 0 : i32
    %c0_i32_0 = arith.constant 0 : i32
    return %arg0, %c0_i32 : i32, i32
  }
  func.func @transform_1(%arg0: i32, %arg1: i32) -> (i32, i32) {
    %c0_i32 = arith.constant 0 : i32
    %c0_i32_0 = arith.constant 0 : i32
    return %c0_i32, %arg1 : i32, i32
  }
  func.func @transform_2(%arg0: i32, %arg1: i32) -> (i32, i32) {
    %c0_i32 = arith.constant 0 : i32
    %c0_i32_0 = arith.constant 0 : i32
    return %c0_i32, %arg1 : i32, i32
  }
  func.func @transform_3(%arg0: i32, %arg1: i32) -> (i32, i32) {
    %c0_i32 = arith.constant 0 : i32
    %c0_i32_0 = arith.constant 0 : i32
    return %arg1, %c0_i32 : i32, i32
  }
  func.func @transform_4(%arg0: i32, %arg1: i32) -> (i32, i32) {
    %c0_i32 = arith.constant 0 : i32
    %c0_i32_0 = arith.constant 0 : i32
    %c0_i32_1 = arith.constant 0 : i32
    return %c0_i32, %c0_i32_0 : i32, i32
  }
  func.func @transform_5(%arg0: i32, %arg1: i32) -> (i32, i32) {
    %c0_i32 = arith.constant 0 : i32
    %c0_i32_0 = arith.constant 0 : i32
    return %arg0, %c0_i32 : i32, i32
  }
}

</mosaic_0001>

<bundles_post_ra>
// kernel: tpu_custom_call.1
= control target key start
LH: loop header
LB: loop body
LE: loop exit
PB: predicated region body
PF: predicated region fallthrough
CT: control target
= control target key end

     0   :  { %s1994_s0 = inlined_call_operand.hbm [shape: bf16[16,128], index: 0, kind: input, shape index: {}]   ;;  %s1995_s1 = inlined_call_operand.hbm [shape: bf16[128,512], index: 1, kind: input, shape index: {}]   ;;  %s1996_s2 = inlined_call_operand.hbm [shape: f32[1,512], index: 2, kind: input, shape index: {}]   ;;  %s1997_s3 = inlined_call_operand.hbm [shape: bf16[512,128], index: 3, kind: input, shape index: {}]   ;;  %s1998_s4 = inlined_call_operand.vmem [shape: f32[1,128], index: 4, kind: input, shape index: {}]   ;;  %s1999_s5 = inlined_call_operand.hbm [shape: f32[16,128], index: 5, kind: output, shape index: {}]  }
   0x1   :  { %2004 = sst [smem:[#allocation16_spill]] %s1995_s1 }
   0x2   :  { %10 = vsyncpa [#allocation4], 0 }
   0x3   :  { %12 = vsyncpa [#allocation4 + $0x1], 0 }
   0x4   :  { %13 = vsyncpa [#allocation7], 0 }
   0x5   :  { %14 = vsyncpa [#allocation10], 0 }
   0x6   :  { %15 = vsyncpa [#allocation5], 0 }
   0x7   :  { %17 = vsyncpa [#allocation5 + $0x1], 0  ;;  %s1769_s18 = smov 0   ;;  %s1771_s19 = smov 0  }
   0x8   :  { %s1773_s20 = smov 0   ;;  %s1775_s21 = smov 0  }
   0x9   :  { %s1777_s22 = smov 0   ;;  %s1779_s23 = smov 0  }
   0xa LB: > { %s1211_s24 = sadd.s32 4294967295, %s1727_s23   ;;  %s1212_s25 = sadd.s32 4294967294, %s1727_s23   ;;  %s1727_s23 = sphi %s1779_s23, %s23_s23   ;;  %s1723_s22 = sphi %s1777_s22, %s2023_s22   ;;  %s1719_s21 = sphi %s1775_s21, %s2022_s21   ;;  %s1715_s20 = sphi %s1773_s20, %s2021_s20   ;;  %s1711_s19 = sphi %s1771_s19, %s2020_s19   ;;  %s1707_s18 = sphi %s1769_s18, %s2019_s18  }
   0xb   : > { %p55_p0 = scmp.ne.s32.totalorder %s1711_s19, %s1707_s18  ;;  %p1803_p1 = scmp.eq.s32.totalorder %s1211_s24, 0 }
   0xc   : > { %p1807_p2 = scmp.eq.s32.totalorder %s1211_s24, 1  ;;  %p184_p3 = scmp.eq.s32.totalorder %s1212_s25, 1 }
   0xd   : > { %s2005_s26 = scalar_select %p1803_p1, 1, 0 }
   0xe   : > { %p1813_p4 = por %p1803_p1, %p55_p0  ;;  %p1213_p5 = scmp.ge.s32.totalorder %s1727_s23, 1 }
   0xf   : > { %p1818_p6 = por %p184_p3, %p55_p0  ;;  %p191_p7 = scmp.lt.s32.totalorder %s1727_s23, 3 }
  0x10   : > { %s2007_s28 = scalar_select %p1813_p4, 1, 0 }
  0x11   : > { %s2008_s29 = scalar_select %p1818_p6, 1, 0 }
  0x12   : > { %p1823_p8 = pnand %p1213_p5, %p191_p7  ;;  %s1729_s6 = smov [#allocation6]  }
  0x13   : > { %s206_s7 = sshll.u32 %s1729_s6, 4  ;;  %s1730_s9 = smov [#allocation8]   ;;  %s207_s7 = int_to_ptr.vmem [resolvable:$true] %s206_s7 }
  0x14   : > { %s2009_s30 = scalar_select %p1823_p8, 1, 0 }
  0x15   : > { %p1355_p9 = pneg %p1823_p8  ;;  %s223_s10 = sshll.u32 %s1730_s9, 4  ;;  %s224_s10 = int_to_ptr.vmem [resolvable:$true] %s223_s10 }
  0x16   : > { %s1731_s11 = smov [#allocation9]   ;;  %s1544_s13 = scalar_lea.vmem %s207_s7, 4096 }
  0x17   : > { %p1832_p11 = pnand %p1355_p9, %p1803_p1  ;;  %s236_s12 = sshll.u32 %s1731_s11, 4  ;;  %s237_s12 = int_to_ptr.vmem [resolvable:$true] %s236_s12 }
  0x18   : > { %p1545_p13 = scmp.ne.s32.totalorder %s207_s7, %s1544_s13  ;;  %p1552_p5 = scmp.lt.s32.totalorder %s207_s7, %s207_s7 }
  0x19   : > { %p1535_p12 = pneg %p1832_p11  ;;  %p1553_p7 = scmp.lt.s32.totalorder %s1544_s13, %s1544_s13 }
  0x1b   : > { %p1547_p0 = pnand %p1545_p13, %p1535_p12  ;;  %p1554_p9 = por %p1553_p7, %p1552_p5 }
  0x1d   : > { %p1548_p3 = pneg %p1547_p0 }
  0x1f   : > { %p1555_p10 = pnand %p1554_p9, %p1548_p3 }
  0x21   : > { %1558 = shalt.err (!%p1555_p10)
}
  0x22   : > { %s1732_s14 = smov 256   ;;  %s1733_s15 = smov 16  }
  0x23   : > { %s2011_s1 = sld [smem:[#allocation16_spill]]  ;;  %s1570_s24 = scalar_lea.vmem %s224_s10, 64 }
  0x24   : > { %p1571_p6 = scmp.ne.s32.totalorder %s224_s10, %s1570_s24  ;;  %p1578_p1 = scmp.lt.s32.totalorder %s224_s10, %s224_s10 }
  0x25   : > { %p1579_p4 = scmp.lt.s32.totalorder %s1570_s24, %s1570_s24 }
  0x26   : > { %p1573_p13 = pnand %p1571_p6, %p1535_p12 }
  0x27   : > { %p1580_p5 = por %p1579_p4, %p1578_p1 }
  0x28   : > { %p1574_p0 = pneg %p1573_p13 }
  0x29   : > { %1358 = dma.hbm_to_vmem [thread:$0]  (!%p1832_p11), %s2011_s1, 4096, %s207_s7, [#allocation7], %s1732_s14, %s1732_s14, %s1733_s15  }
  0x2a   : > { %p1581_p3 = pnand %p1580_p5, %p1574_p0 }
  0x2c   : > { %1584 = shalt.err (!%p1581_p3)
}
  0x2d   : > { %1361 = dma.hbm_to_vmem [thread:$0]  (!%p1832_p11), %s1996_s2, 64, %s224_s10, [#allocation7]  }
  0x2e   : > { %s1596_s7 = scalar_lea.vmem %s237_s12, 4096  ;;  %p1604_p9 = scmp.lt.s32.totalorder %s237_s12, %s237_s12 }
  0x2f   : > { %p1597_p10 = scmp.ne.s32.totalorder %s237_s12, %s1596_s7  ;;  %p1605_p13 = scmp.lt.s32.totalorder %s1596_s7, %s1596_s7 }
  0x31   : > { %p1599_p7 = pnand %p1597_p10, %p1535_p12  ;;  %p1606_p8 = por %p1605_p13, %p1604_p9 }
  0x33   : > { %p1600_p6 = pneg %p1599_p7 }
  0x35   : > { %p1607_p1 = pnand %p1606_p8, %p1600_p6 }
  0x37   : > { %1610 = shalt.err (!%p1607_p1)
}
  0x38   : > { %s1734_s9 = smov 64   ;;  %s1735_s10 = smov 4  }
  0x39   : > { %1364 = dma.hbm_to_vmem [thread:$0]  (!%p1832_p11), %s1997_s3, 4096, %s237_s12, [#allocation10], %s1734_s9, %s1734_s9, %s1735_s10  }
  0x3a   : > { %s42_s14 = sadd.s32 1, %s1715_s20  ;;  %s35_s15 = sadd.s32 1, %s1723_s22 }
  0x3b   : > { %p49_p4 = scmp.ne.s32.totalorder %s1715_s20, %s1711_s19  ;;  %p37_p8 = scmp.ge.s32.totalorder %s35_s15, 2 }
  0x3c   : > { %p50_p12 = scmp.eq.s32.totalorder %s1727_s23, 0  ;;  %p1376_p5 = scmp.lt.s32.totalorder %s1727_s23, 2 }
  0x3d   : > { %p1869_p0 = por %p1807_p2, %p49_p4  ;;  %s2025_s15 = smov (%p37_p8, %s35_s15), 0 }
  0x3e   : > { %p51_p3 = por %p50_p12, %p49_p4  ;;  %s253_s8 = sand.u32 1, %s1715_s20  }
  0x3f   : > { %s39_s17 = ssub.s32 %s1723_s22, %s2025_s15  ;;  %s1218_s12 = sshll.u32 %s253_s8, 2 }
  0x40   : > { %p40_p10 = scmp.eq.s32.totalorder %s39_s17, 0  ;;  %s1219_s24 = sshll.u32 %s1723_s22, 6 }
  0x41   : > { %s262_s27 = scalar_lea.hbm %s1994_s0, %s1219_s24  ;;  %s257_s9 = scalar_lea.vmem [#allocation3], %s1218_s12 }
  0x42   : > { %s1881_s25 = scalar_select %p40_p10, %s1715_s20, %s42_s14  }
  0x43   : > { %s264_s10 = sshll.u32 %s257_s9, 4  ;;  %p1888_p2 = pnand %p1376_p5, %p51_p3  ;;  %s265_s10 = int_to_ptr.vmem [resolvable:$true] %s264_s10 }
  0x44   : > { %s254_s13 = scalar_lea.sflag [#allocation4], %s253_s8  ;;  %s1624_s17 = scalar_lea.vmem %s265_s10, 64 }
  0x45   : > { %p1613_p11 = pneg %p1888_p2  ;;  %p1625_p7 = scmp.ne.s32.totalorder %s265_s10, %s1624_s17 }
  0x46   : > { %s1736_s14 = smov [#allocation3]  }
  0x47   : > { %p1627_p6 = pnand %p1625_p7, %p1613_p11  ;;  %s1629_s1 = sshll.u32 %s1736_s14, 4  ;;  %s1630_s1 = int_to_ptr.vmem [resolvable:$false] %s1629_s1 }
  0x48   : > { %s1631_s24 = scalar_lea.vmem %s1630_s1, 128  ;;  %p1632_p13 = scmp.lt.s32.totalorder %s265_s10, %s1630_s1 }
  0x49   : > { %p1628_p9 = pneg %p1627_p6  ;;  %p1633_p1 = scmp.lt.s32.totalorder %s1631_s24, %s1624_s17 }
  0x4b   : > { %p1634_p4 = por %p1633_p1, %p1632_p13 }
  0x4d   : > { %p1635_p8 = pnand %p1634_p4, %p1628_p9 }
  0x4f   : > { %1638 = shalt.err (!%p1635_p8)
}
  0x50   : > { %1368 = dma.hbm_to_vmem [thread:$0]  (!%p1888_p2), %s262_s27, 64, %s265_s10, %s254_s13  }
  0x51   : > { %p2014_p12 = scmp.ne.s32.totalorder %s2009_s30, 0 }
  0x52   : > { %s1899_s8 = sand.u32 (!%p2014_p12), 1, %s1711_s19   ;;  %p2015_p5 = scmp.ne.s32.totalorder (!%p2014_p12), %s2007_s28, 0 }
  0x53   : > { %273 = sbr.rel (%p2014_p12) target bundleno = 594 (0x252), region = 40  ;;  %s1221_s12 = sshll.u32 (!%p2014_p12), %s1899_s8, 2 }
  0x54   : > { %s276_s6 = scalar_lea.sflag (!%p2014_p12), [#allocation4], %s1899_s8  ;;  %s1903_s7 = scalar_lea.vmem (!%p2014_p12), [#allocation3], %s1221_s12 }
  0x58   : > { %1690 = dma.done.wait (%p2015_p5), %s276_s6, 64  }
  0x59   : > { %1692 = vsyncadd (%p2015_p5), %s276_s6, 4294967232  ;;  %p2016_p3 = scmp.ne.s32.totalorder %s2005_s26, 0 }
  0x5b   : > { %1694 = dma.done.wait (%p2016_p3), [#allocation7], 4160  }
  0x5c   : > { %1696 = vsyncadd (%p2016_p3), [#allocation7], 4294963136 }
  0x5d   : > { %1698 = dma.done.wait (%p2016_p3), [#allocation10], 4096  }
  0x5e   : > { %1700 = vsyncadd (%p2016_p3), [#allocation10], 4294963200  ;;  %v1737_v0 = vmov 0   ;;  %v1437_v1 = vld [vmem:[#allocation6 + $0xe4] ss:$16 sps:$4 sm:$0xff]   ;;  %v1485_v34 = vld [vmem:[#allocation9 + $0x78] sm:$0xff]  }
  0x5f   : > { %574 = vmatprep.mubr.bf16.mxu0 %v1737_v0  ;;  %615 = vmatprep.mubr.bf16.mxu1 %v1737_v0  ;;  %v1439_v2 = vld [vmem:[#allocation6 + $0xec] ss:$16 sps:$4 sm:$0xff]   ;;  %v1441_v3 = vld [vmem:[#allocation6 + $0xe0] ss:$16 sps:$4 sm:$0xff]   ;;  %v1442_v4 = vld [vmem:[#allocation6 + $0xe8] ss:$16 sps:$4 sm:$0xff]  }
  0x60   : > { %542 = vmatprep.subr.bf16.mxu0 %v1437_v1  ;;  %583 = vmatprep.subr.bf16.mxu1 %v1439_v2  ;;  %v1443_v5 = vld [vmem:[#allocation6 + $0xc4] ss:$16 sps:$4 sm:$0xff]   ;;  %v1445_v6 = vld [vmem:[#allocation6 + $0xcc] ss:$16 sps:$4 sm:$0xff]   ;;  %v1447_v7 = vld [vmem:[#allocation6 + $0xc0] ss:$16 sps:$4 sm:$0xff]   ;;  %v362_v2 = vlaneseq }
  0x61   : > { %543 = vmatpush1.bf16.msra.mxu0 %v1441_v3  ;;  %584 = vmatpush1.bf16.msra.mxu1 %v1442_v4  ;;  %v1448_v8 = vld [vmem:[#allocation6 + $0xc8] ss:$16 sps:$4 sm:$0xff]   ;;  %v1449_v9 = vld [vmem:[#allocation6 + $0xa4] ss:$16 sps:$4 sm:$0xff]   ;;  %v1451_v10 = vld [vmem:[#allocation6 + $0xac] ss:$16 sps:$4 sm:$0xff]  }
  0x62   : > { %544 = vmatprep.subr.bf16.mxu0 %v1443_v5  ;;  %585 = vmatprep.subr.bf16.mxu1 %v1445_v6  ;;  %v1453_v11 = vld [vmem:[#allocation6 + $0xa0] ss:$16 sps:$4 sm:$0xff]   ;;  %v1454_v12 = vld [vmem:[#allocation6 + $0xa8] ss:$16 sps:$4 sm:$0xff]   ;;  %v1455_v13 = vld [vmem:[#allocation6 + $0x84] ss:$16 sps:$4 sm:$0xff]  }
  0x63   : > { %v1457_v14 = vld [vmem:[#allocation6 + $0x8c] ss:$16 sps:$4 sm:$0xff]   ;;  %v1459_v15 = vld [vmem:[#allocation6 + $0x80] ss:$16 sps:$4 sm:$0xff]   ;;  %v1460_v16 = vld [vmem:[#allocation6 + $0x88] ss:$16 sps:$4 sm:$0xff]  }
  0x64   : > { %v1461_v17 = vld [vmem:[#allocation6 + $0x64] ss:$16 sps:$4 sm:$0xff]   ;;  %v1463_v18 = vld [vmem:[#allocation6 + $0x6c] ss:$16 sps:$4 sm:$0xff]   ;;  %v1465_v19 = vld [vmem:[#allocation6 + $0x60] ss:$16 sps:$4 sm:$0xff]  }
  0x65   : > { %545 = vmatpush1.bf16.msra.mxu0 %v1447_v7  ;;  %586 = vmatpush1.bf16.msra.mxu1 %v1448_v8  ;;  %v1466_v20 = vld [vmem:[#allocation6 + $0x68] ss:$16 sps:$4 sm:$0xff]   ;;  %v1467_v21 = vld [vmem:[#allocation6 + $0x44] ss:$16 sps:$4 sm:$0xff]   ;;  %v1469_v22 = vld [vmem:[#allocation6 + $0x4c] ss:$16 sps:$4 sm:$0xff]  }
  0x66   : > { %546 = vmatprep.subr.bf16.mxu0 %v1449_v9  ;;  %587 = vmatprep.subr.bf16.mxu1 %v1451_v10  ;;  %v1471_v23 = vld [vmem:[#allocation6 + $0x40] ss:$16 sps:$4 sm:$0xff]   ;;  %v1472_v24 = vld [vmem:[#allocation6 + $0x48] ss:$16 sps:$4 sm:$0xff]   ;;  %v1473_v25 = vld [vmem:[#allocation6 + $0x24] ss:$16 sps:$4 sm:$0xff]  }
  0x67   : > { %v1475_v26 = vld [vmem:[#allocation6 + $0x2c] ss:$16 sps:$4 sm:$0xff]   ;;  %v1477_v27 = vld [vmem:[#allocation6 + $0x20] ss:$16 sps:$4 sm:$0xff]   ;;  %v1478_v28 = vld [vmem:[#allocation6 + $0x28] ss:$16 sps:$4 sm:$0xff]  }
  0x68   : > { %v1479_v29 = vld [vmem:[#allocation6 + $0x4] ss:$16 sps:$4 sm:$0xff]   ;;  %v1481_v30 = vld [vmem:[#allocation6 + $0xc] ss:$16 sps:$4 sm:$0xff]   ;;  %v1483_v31 = vld [vmem:[#allocation6] ss:$16 sps:$4 sm:$0xff]  }
  0x69   : > { %547 = vmatpush1.bf16.msra.mxu0 %v1453_v11  ;;  %588 = vmatpush1.bf16.msra.mxu1 %v1454_v12  ;;  %v1484_v32 = vld [vmem:[#allocation6 + $0x8] ss:$16 sps:$4 sm:$0xff]   ;;  %v1486_v35 = vld [vmem:[#allocation9 + $0xf8] sm:$0xff]   ;;  %v1493_v42 = vld [vmem:[#allocation9 + $0x68] sm:$0xff]   ;;  %v363_v3 = vshrl.u32 %v362_v2, 7  ;;  %s1225_s1 = sshll.u32 %s1899_s8, 3 }
  0x6a   : > { %548 = vmatprep.subr.bf16.mxu0 %v1455_v13  ;;  %589 = vmatprep.subr.bf16.mxu1 %v1457_v14  ;;  %v327_v33 = vld [vmem:[%s1903_s7] sm:$0xf]  ;;  %v1494_v43 = vld [vmem:[#allocation9 + $0xe8] sm:$0xff]   ;;  %v1497_v46 = vld [vmem:[#allocation9 + $0x60] sm:$0xff]   ;;  %s1292_s30 = sshll.u32 %s1719_s21, 7  ;;  %s317_s27 = scalar_lea.vmem [#allocation11], %s1225_s1 }
  0x6b   : > { %v1487_v36 = vld [vmem:[#allocation9 + $0x38] sm:$0xff]   ;;  %v1489_v38 = vld [vmem:[#allocation9 + $0x70] sm:$0xff]   ;;  %v1495_v44 = vld [vmem:[#allocation9 + $0x28] sm:$0xff]   ;;  %v364_v4 = vsub.s32 0, %v363_v3  ;;  %v372_v5 = vsub.s32 2, %v363_v3  ;;  %v368_v7 = vsub.s32 1, %v363_v3  ;;  %s1096_s13 = scalar_lea.hbm %s1999_s5, %s1292_s30 }
  0x6c   : > { %v1488_v37 = vld [vmem:[#allocation9 + $0xb8] sm:$0xff]   ;;  %v1490_v39 = vld [vmem:[#allocation9 + $0xf0] sm:$0xff]   ;;  %v1496_v45 = vld [vmem:[#allocation9 + $0xa8] sm:$0xff]   ;;  %v376_v8 = vsub.s32 3, %v363_v3  ;;  %s1098_s9 = sshll.u32 %s317_s27, 4  ;;  %s1085_s17 = scalar_lea.sflag [#allocation5], %s1899_s8  ;;  %s1099_s9 = int_to_ptr.vmem [resolvable:$true] %s1098_s9 }
  0x6d   : > { %549 = vmatpush1.bf16.msra.mxu0 %v1459_v15  ;;  %590 = vmatpush1.bf16.msra.mxu1 %v1460_v16  ;;  %v1491_v40 = vld [vmem:[#allocation9 + $0x30] sm:$0xff]   ;;  %v1498_v47 = vld [vmem:[#allocation9 + $0xe0] sm:$0xff]   ;;  %v1501_v50 = vld [vmem:[#allocation9 + $0x58] sm:$0xff]   ;;  %s1639_s14 = scalar_lea.vmem %s1099_s9, 128  ;;  %s1738_s24 = smov [#allocation11]  }
  0x6e   : > { %550 = vmatprep.subr.bf16.mxu0 %v1461_v17  ;;  %591 = vmatprep.subr.bf16.mxu1 %v1463_v18  ;;  %v1492_v41 = vld [vmem:[#allocation9 + $0xb0] sm:$0xff]   ;;  %v1499_v48 = vld [vmem:[#allocation9 + $0x20] sm:$0xff]   ;;  %v1502_v51 = vld [vmem:[#allocation9 + $0xd8] sm:$0xff]   ;;  %p1640_p10 = scmp.ne.s32.totalorder %s1099_s9, %s1639_s14  ;;  %s1643_s12 = sshll.u32 %s1738_s24, 4  ;;  %s1644_s12 = int_to_ptr.vmem [resolvable:$false] %s1643_s12 }
  0x6f   : > { %v1500_v49 = vld [vmem:[#allocation9 + $0xa0] sm:$0xff]   ;;  %v1503_v52 = vld [vmem:[#allocation9 + $0x18] sm:$0xff]   ;;  %v1505_v54 = vld [vmem:[#allocation9 + $0x50] sm:$0xff]   ;;  %s1645_s21 = scalar_lea.vmem %s1644_s12, 256  ;;  %p1646_p7 = scmp.lt.s32.totalorder %s1099_s9, %s1644_s12 }
  0x70   : > { %v1504_v53 = vld [vmem:[#allocation9 + $0x98] sm:$0xff]   ;;  %v1506_v55 = vld [vmem:[#allocation9 + $0xd0] sm:$0xff]   ;;  %v1509_v58 = vld [vmem:[#allocation9 + $0x48] sm:$0xff]   ;;  %p1641_p2 = pnand %p1640_p10, %p1869_p0  ;;  %p1647_p6 = scmp.lt.s32.totalorder %s1645_s21, %s1639_s14 }
  0x71   : > { %551 = vmatpush1.bf16.msra.mxu0 %v1465_v19  ;;  %592 = vmatpush1.bf16.msra.mxu1 %v1466_v20  ;;  %v1507_v56 = vld [vmem:[#allocation9 + $0x10] sm:$0xff]   ;;  %v1510_v59 = vld [vmem:[#allocation9 + $0xc8] sm:$0xff]   ;;  %v1513_v62 = vld [vmem:[#allocation9 + $0x40] sm:$0xff]  }
  0x72   : > { %552 = vmatprep.subr.bf16.mxu0 %v1467_v21  ;;  %593 = vmatprep.subr.bf16.mxu1 %v1469_v22  ;;  %v1508_v57 = vld [vmem:[#allocation9 + $0x90] sm:$0xff]   ;;  %v1511_v60 = vld [vmem:[#allocation9 + $0x8] sm:$0xff]   ;;  %v1514_v63 = vld [vmem:[#allocation9 + $0xc0] sm:$0xff]   ;;  %p1642_p11 = pneg %p1641_p2  ;;  %p1648_p9 = por %p1647_p6, %p1646_p7 }
  0x73   : > { %v1512_v61 = vld [vmem:[#allocation9 + $0x88] sm:$0xff]   ;;  %v1515_v0 = vld [vmem:[#allocation9] sm:$0xff]   ;;  %v360_v6 = vld [vmem:[#allocation8] sm:$0xf] }
  0x74   : > { %v1516_v1 = vld [vmem:[#allocation9 + $0x80] sm:$0xff]   ;;  %v365_v9 = vrot.slane %v360_v6, %v364_v4  ;;  %v373_v10 = vrot.slane %v360_v6, %v372_v5  ;;  %v369_v13 = vrot.slane %v360_v6, %v368_v7  ;;  %v377_v14 = vrot.slane %v360_v6, %v376_v8  ;;  %p1649_p13 = pnand %p1648_p9, %p1642_p11 }
  0x75   : > { %553 = vmatpush1.bf16.msra.mxu0 %v1471_v23  ;;  %594 = vmatpush1.bf16.msra.mxu1 %v1472_v24 }
  0x76   : > { %554 = vmatprep.subr.bf16.mxu0 %v1473_v25  ;;  %595 = vmatprep.subr.bf16.mxu1 %v1475_v26 }
  0x79   : > { %555 = vmatpush1.bf16.msra.mxu0 %v1477_v27  ;;  %596 = vmatpush1.bf16.msra.mxu1 %v1478_v28 }
  0x7a   : > { %556 = vmatprep.subr.bf16.mxu0 %v1479_v29  ;;  %597 = vmatprep.subr.bf16.mxu1 %v1481_v30 }
  0x7d   : > { %557 = vmatpush1.bf16.msra.mxu0 %v1483_v31  ;;  %598 = vmatpush1.bf16.msra.mxu1 %v1484_v32 }
  0x7e   : > { %1295 = vmatprep.subr.bf16.mxu0 %v1485_v34  ;;  %1317 = vmatprep.subr.bf16.mxu1 %v1486_v35 }
  0x80   : > { %575 = vmatmul.mubr.bf16.vlgmr.msra.gmra.mxu0 %v327_v33  ;;  %616 = vmatmul.mubr.bf16.vlgmr.msra.gmra.mxu1 %v327_v33 }
  0x81   : > { %1296 = vmatpush3.bf16.msra.mxu0 %v1487_v36  ;;  %1318 = vmatpush3.bf16.msra.mxu1 %v1488_v37 }
  0x82   : > { %1297 = vmatprep.subr.bf16.mxu0 %v1489_v38  ;;  %1319 = vmatprep.subr.bf16.mxu1 %v1490_v39 }
  0x85   : > { %1298 = vmatpush3.bf16.msra.mxu0 %v1491_v40  ;;  %1320 = vmatpush3.bf16.msra.mxu1 %v1492_v41 }
  0x86   : > { %1299 = vmatprep.subr.bf16.mxu0 %v1493_v42  ;;  %1321 = vmatprep.subr.bf16.mxu1 %v1494_v43 }
  0x89   : > { %1300 = vmatpush3.bf16.msra.mxu0 %v1495_v44  ;;  %1322 = vmatpush3.bf16.msra.mxu1 %v1496_v45 }
  0x8a   : > { %1301 = vmatprep.subr.bf16.mxu0 %v1497_v46  ;;  %1323 = vmatprep.subr.bf16.mxu1 %v1498_v47 }
  0x8d   : > { %1302 = vmatpush3.bf16.msra.mxu0 %v1499_v48  ;;  %1324 = vmatpush3.bf16.msra.mxu1 %v1500_v49 }
  0x8e   : > { %1303 = vmatprep.subr.bf16.mxu0 %v1501_v50  ;;  %1325 = vmatprep.subr.bf16.mxu1 %v1502_v51 }
  0x91   : > { %1304 = vmatpush3.bf16.msra.mxu0 %v1503_v52  ;;  %1326 = vmatpush3.bf16.msra.mxu1 %v1504_v53 }
  0x92   : > { %1305 = vmatprep.subr.bf16.mxu0 %v1505_v54  ;;  %1327 = vmatprep.subr.bf16.mxu1 %v1506_v55 }
  0x95   : > { %1306 = vmatpush3.bf16.msra.mxu0 %v1507_v56  ;;  %1328 = vmatpush3.bf16.msra.mxu1 %v1508_v57 }
  0x96   : > { %1307 = vmatprep.subr.bf16.mxu0 %v1509_v58  ;;  %1329 = vmatprep.subr.bf16.mxu1 %v1510_v59 }
  0x99   : > { %1308 = vmatpush3.bf16.msra.mxu0 %v1511_v60  ;;  %1330 = vmatpush3.bf16.msra.mxu1 %v1512_v61 }
  0x9a   : > { %1309 = vmatprep.subr.bf16.mxu0 %v1513_v62  ;;  %1331 = vmatprep.subr.bf16.mxu1 %v1514_v63 }
  0x9d   : > { %1310 = vmatpush3.bf16.msra.mxu0 %v1515_v0  ;;  %1332 = vmatpush3.bf16.msra.mxu1 %v1516_v1 }
 0x140   : > { %v576_v11 = vpop.f32.mrf.mxu0  ;;  %v617_v12 = vpop.f32.mrf.mxu1 }
 0x141   : > { %v1918_v15 = vadd.f32 %v576_v11, %v365_v9  ;;  %v1920_v16 = vadd.f32 %v617_v12, %v373_v10 }
 0x142   : > { %v578_v17 = vpop.f32.mrf.mxu0  ;;  %v619_v18 = vpop.f32.mrf.mxu1 }
 0x143   : > { %v1923_v19 = vmul.f32 0.70710677, %v1918_v15  ;;  %v1926_v20 = vmul.f32 0.70710677, %v1920_v16  ;;  %v1928_v21 = vadd.f32 %v578_v17, %v369_v13  ;;  %v1930_v22 = vadd.f32 %v619_v18, %v377_v14 }
 0x144   : > { %v580_v23 = vpop.f32.mrf.mxu0  ;;  %v621_v24 = vpop.f32.mrf.mxu1 }
 0x145   : > { %v628_v25 = vand.u32 2147483647, %v1923_v19  ;;  %v630_v26 = vand.u32 2147483647, %v1926_v20  ;;  %v1935_v27 = vmul.f32 0.70710677, %v1928_v21 }
 0x146   : > { %v1938_v28 = vmul.f32 0.70710677, %v1930_v22  ;;  %v581_v29 = vpop.f32.mrf.mxu0  ;;  %v622_v30 = vpop.f32.mrf.mxu1  ;;  %vm704_vm0 = vcmp.ge.f32.partialorder %v1923_v19, 0.0  ;;  %vm706_vm1 = vcmp.ge.f32.partialorder %v1926_v20, 0.0  ;;  %v718_v20 = vmul.f32 0.5, %v1920_v16 }
 0x147   : > { %v632_v31 = vmul.f32 0.3275911, %v628_v25  ;;  %v634_v32 = vmul.f32 0.3275911, %v630_v26  ;;  %v629_v33 = vand.u32 2147483647, %v1935_v27 }
 0x148   : > { %v631_v34 = vand.u32 2147483647, %v1938_v28  ;;  %v680_v41 = vsub.f32 0.0, %v628_v25  ;;  %v682_v42 = vsub.f32 0.0, %v630_v26  ;;  %vm705_vm2 = vcmp.ge.f32.partialorder %v1935_v27, 0.0 }
 0x149   : > { %v636_v35 = vadd.f32 1.0, %v632_v31  ;;  %v638_v36 = vadd.f32 1.0, %v634_v32  ;;  %v633_v37 = vmul.f32 0.3275911, %v629_v33  ;;  %v681_v44 = vsub.f32 0.0, %v629_v33 }
 0x14a   : > { %v635_v38 = vmul.f32 0.3275911, %v631_v34  ;;  %v684_v43 = vmul.f32 %v680_v41, %v628_v25  ;;  %v686_v45 = vmul.f32 %v682_v42, %v630_v26  ;;  %v683_v46 = vsub.f32 0.0, %v631_v34 }
 0x14b   : > { %1517 = vrcp.f32 %v636_v35  ;;  %v637_v39 = vadd.f32 1.0, %v633_v37  ;;  %v685_v51 = vmul.f32 %v681_v44, %v629_v33  ;;  %vm707_vm3 = vcmp.ge.f32.partialorder %v1938_v28, 0.0 }
 0x14c   : > { %1519 = vrcp.f32 %v638_v36  ;;  %v639_v40 = vadd.f32 1.0, %v635_v38  ;;  %v688_v50 = vmul.f32 1.442695, %v684_v43  ;;  %v692_v53 = vmul.f32 1.442695, %v686_v45 }
 0x14d   : > { %1521 = vrcp.f32 %v637_v39  ;;  %v687_v54 = vmul.f32 %v683_v46, %v631_v34  ;;  %v690_v59 = vmul.f32 1.442695, %v685_v51 }
 0x14e   : > { %1523 = vrcp.f32 %v639_v40 }
 0x14f   : > { %1525 = vpow2.f32 %v688_v50  ;;  %v694_v63 = vmul.f32 1.442695, %v687_v54 }
 0x150   : > { %1527 = vpow2.f32 %v692_v53 }
 0x151   : > { %1529 = vpow2.f32 %v690_v59  ;;  %v717_v59 = vmul.f32 0.5, %v1928_v21 }
 0x152   : > { %1531 = vpow2.f32 %v694_v63 }
 0x158   : > { %v1518_v47 = vpop.eup %1517 }
 0x159   : > { %v1520_v48 = vpop.eup %1519  ;;  %v644_v49 = vmul.f32 1.0614054, %v1518_v47 }
 0x15a   : > { %v646_v52 = vmul.f32 1.0614054, %v1520_v48  ;;  %v1522_v56 = vpop.eup %1521 }
 0x15b   : > { %v648_v55 = vadd.f32 -1.4531521, %v644_v49  ;;  %v645_v60 = vmul.f32 1.0614054, %v1522_v56  ;;  %v1524_v61 = vpop.eup %1523 }
 0x15c   : > { %v650_v57 = vadd.f32 -1.4531521, %v646_v52  ;;  %v647_v2 = vmul.f32 1.0614054, %v1524_v61  ;;  %v1526_v31 = vpop.eup %1525 }
 0x15d   : > { %v652_v58 = vmul.f32 %v1518_v47, %v648_v55  ;;  %v649_v1 = vadd.f32 -1.4531521, %v645_v60  ;;  %v1528_v33 = vpop.eup %1527  ;;  %v716_v55 = vmul.f32 0.5, %v1918_v15 }
 0x15e   : > { %v654_v62 = vmul.f32 %v1520_v48, %v650_v57  ;;  %v651_v6 = vadd.f32 -1.4531521, %v647_v2  ;;  %v1530_v41 = vpop.eup %1529 }
 0x15f   : > { %v656_v0 = vadd.f32 1.4214138, %v652_v58  ;;  %v653_v5 = vmul.f32 %v1522_v56, %v649_v1  ;;  %v1532_v46 = vpop.eup %1531 }
 0x160   : > { %v658_v3 = vadd.f32 1.4214138, %v654_v62  ;;  %v655_v10 = vmul.f32 %v1524_v61, %v651_v6  ;;  %v719_v62 = vmul.f32 0.5, %v1930_v22 }
 0x161   : > { %v660_v4 = vmul.f32 %v1518_v47, %v656_v0  ;;  %v657_v9 = vadd.f32 1.4214138, %v653_v5 }
 0x162   : > { %v662_v7 = vmul.f32 %v1520_v48, %v658_v3  ;;  %v659_v14 = vadd.f32 1.4214138, %v655_v10 }
 0x163   : > { %v664_v8 = vadd.f32 -0.28449672, %v660_v4  ;;  %v661_v13 = vmul.f32 %v1522_v56, %v657_v9 }
 0x164   : > { %v666_v11 = vadd.f32 -0.28449672, %v662_v7  ;;  %v663_v24 = vmul.f32 %v1524_v61, %v659_v14 }
 0x165   : > { %v668_v12 = vmul.f32 %v1518_v47, %v664_v8  ;;  %v665_v23 = vadd.f32 -0.28449672, %v661_v13  ;;  %v1290_v8 = vld [vmem:[%s1998_s4] ss:$0 sm:$0xff] }
 0x166   : > { %v670_v17 = vmul.f32 %v1520_v48, %v666_v11  ;;  %v667_v30 = vadd.f32 -0.28449672, %v663_v24 }
 0x167   : > { %v672_v18 = vadd.f32 0.2548296, %v668_v12  ;;  %v669_v29 = vmul.f32 %v1522_v56, %v665_v23 }
 0x168   : > { %v674_v25 = vadd.f32 0.2548296, %v670_v17  ;;  %v671_v36 = vmul.f32 %v1524_v61, %v667_v30 }
 0x169   : > { %v676_v26 = vmul.f32 %v1518_v47, %v672_v18  ;;  %v673_v35 = vadd.f32 0.2548296, %v669_v29 }
 0x16a   : > { %v678_v32 = vmul.f32 %v1520_v48, %v674_v25  ;;  %v675_v40 = vadd.f32 0.2548296, %v671_v36 }
 0x16b   : > { %v696_v34 = vmul.f32 %v1526_v31, %v676_v26  ;;  %v677_v39 = vmul.f32 %v1522_v56, %v673_v35 }
 0x16c   : > { %v698_v37 = vmul.f32 %v1528_v33, %v678_v32  ;;  %v679_v45 = vmul.f32 %v1524_v61, %v675_v40 }
 0x16d   : > { %v700_v38 = vsub.f32 1.0, %v696_v34  ;;  %v697_v44 = vmul.f32 %v1530_v41, %v677_v39 }
 0x16e   : > { %v702_v42 = vsub.f32 1.0, %v698_v37  ;;  %v699_v50 = vmul.f32 %v1532_v46, %v679_v45 }
 0x16f   : > { %v708_v43 = vsub.f32 0.0, %v700_v38  ;;  %v701_v48 = vsub.f32 1.0, %v697_v44 }
 0x170   : > { %v710_v47 = vsub.f32 0.0, %v702_v42  ;;  %v703_v54 = vsub.f32 1.0, %v699_v50 }
 0x171   : > { %v712_v49 = vsel %vm704_vm0, %v700_v38, %v708_v43  ;;  %v709_v53 = vsub.f32 0.0, %v701_v48 }
 0x172   : > { %v714_v51 = vsel %vm706_vm1, %v702_v42, %v710_v47  ;;  %v720_v52 = vadd.f32 1.0, %v712_v49  ;;  %v711_v58 = vsub.f32 0.0, %v703_v54 }
 0x173   : > { %v722_v56 = vadd.f32 1.0, %v714_v51  ;;  %v713_v57 = vsel %vm705_vm2, %v701_v48, %v709_v53 }
 0x174   : > { %v721_v19 = vadd.f32 1.0, %v713_v57  ;;  %v724_v60 = vmul.f32 %v720_v52, %v716_v55  ;;  %v715_v61 = vsel %vm707_vm3, %v703_v54, %v711_v58 }
 0x175   : > { %v723_v0 = vadd.f32 1.0, %v715_v61  ;;  %v726_v27 = vmul.f32 %v722_v56, %v718_v20 }
 0x176   : > { %v725_v63 = vmul.f32 %v721_v19, %v717_v59  ;;  %v729_v2 = vpack.c.bf16 %v724_v60, %v724_v60 }
 0x177   : > { %v727_v15 = vmul.f32 %v723_v0, %v719_v62  ;;  %v731_v21 = vpack.c.bf16 %v726_v27, %v726_v27 }
 0x178   : > { %v730_v1 = vpack.c.bf16 %v725_v63, %v725_v63 }
 0x179   : > { %v732_v3 = vpack.c.bf16 %v727_v15, %v727_v15 }
 0x17a   : > { %1021 = vmatprep.mubr.bf16.mxu0 %v730_v1 }
 0x17b   : > { %1022 = vmatmul.mubr.bf16.vlgmr.msra.gmra.mxu0 %v729_v2  ;;  %1061 = vmatprep.mubr.bf16.mxu1 %v732_v3 }
 0x17c   : > { %1062 = vmatmul.mubr.bf16.vlgmr.msra.gmra.mxu1 %v731_v21 }
 0x23b   : > { %v1311_v28 = vpop.f32.mrf.mxu0 }
 0x23c   : > { %v1333_v16 = vpop.f32.mrf.mxu1 }
 0x23d   : > { %v1312_v4 = vpop.f32.mrf.mxu0 }
 0x23e   : > { %v1313_v5 = vadd.f32 %v1312_v4, %v1311_v28  ;;  %v1334_v22 = vpop.f32.mrf.mxu1 }
 0x23f   : > { %v1314_v6 = vpop.f32.mrf.mxu0  ;;  %v1335_v7 = vadd.f32 %v1334_v22, %v1333_v16 }
 0x240   : > { %v1336_v9 = vpop.f32.mrf.mxu1 }
 0x241   : > { %v1315_v10 = vpop.f32.mrf.mxu0  ;;  %v1064_v11 = vadd.f32 %v1335_v7, %v1313_v5 }
 0x242   : > { %v1337_v12 = vpop.f32.mrf.mxu1 }
 0x243   : > { %v1082_v13 = vadd.f32 %v1290_v8, %v1064_v11 }
 0x245   : > { %1083 = vst [vmem:[%s317_s27] sm:$0xff] %v1082_v13 }
 0x246   : > { %1652 = shalt.err (!%p1649_p13)
}
 0x247   : > { %s1653_s6 = scalar_lea.hbm %s1096_s13, 128  ;;  %s1657_s1 = scalar_lea.hbm %s1999_s5, 256 }
 0x248   : > { %p1654_p1 = scmp.ne.s32.totalorder %s1096_s13, %s1653_s6  ;;  %p1658_p12 = scmp.lt.s32.totalorder %s1096_s13, %s1999_s5 }
 0x249   : > { %p1659_p5 = scmp.lt.s32.totalorder %s1657_s1, %s1653_s6 }
 0x24a   : > { %p1655_p4 = pnand %p1654_p1, %p1869_p0 }
 0x24b   : > { %p1660_p3 = por %p1659_p5, %p1658_p12 }
 0x24c   : > { %p1656_p8 = pneg %p1655_p4 }
 0x24e   : > { %p1661_p10 = pnand %p1660_p3, %p1656_p8 }
 0x250   : > { %1664 = shalt.err (!%p1661_p10)
}
 0x251   : > { %1353 = dma.vmem_to_hbm [thread:$0]  (%p1869_p0), %s1099_s9, 128, %s1096_s13, %s1085_s17  }
 0x252 PF: > { %s1110_s30 = sand.u32 1, %s1707_s18   ;;  %p2017_p2 = scmp.ne.s32.totalorder %s2008_s29, 0 }
 0x253   : > { %p2018_p11 = scmp.ge.s32.totalorder %s1727_s23, 2  ;;  %s1111_s27 = scalar_lea.sflag [#allocation5], %s1110_s30 }
 0x255   : > { %p1370_p7 = pnand %p2018_p11, %p2017_p2 }
 0x257   : > { %p1371_p6 = pneg %p1370_p7 }
 0x259   : > { %1702 = dma.done.wait (%p1371_p6), %s1111_s27, 128  }
 0x25a   : > { %1704 = vsyncadd (%p1371_p6), %s1111_s27, 4294967168  ;;  %s23_s23 = sadd.s32 1, %s1727_s23   ;;  %s2019_s18 = smov %s1711_s19 }
 0x25b   : > { %p20_p9 = scmp.ge.s32.totalorder %s23_s23, 4   ;;  %s2020_s19 = smov %s1715_s20 }
 0x25c   : > { %s2021_s20 = smov %s1881_s25  ;;  %s2022_s21 = smov %s1723_s22 }
 0x25d   : > { %s2023_s22 = smov %s2025_s15  ;;  %22 = sbr.rel (!%p20_p9) target bundleno = 10 (0xa), region = 108 }
 0x262   :  { %1116 = vsyncpa [#allocation4], 1 }
 0x263   :  { %1118 = vsyncpa [#allocation4 + $0x1], 1 }
 0x264   :  { %1119 = vsyncpa [#allocation7], 1 }
 0x265   :  { %1120 = vsyncpa [#allocation10], 1 }
 0x266   :  { %1121 = vsyncpa [#allocation5], 1 }
 0x267   :  { %1123 = vsyncpa [#allocation5 + $0x1], 1 }

</bundles_post_ra>
